<compile_context>
chip_gen: v6e
topology: v6e:2x2x1
jax: 0.10.0
libtpu: 0.0.40
codegen_flags: <defaults>
</compile_context>

<pallas_src>
import jax
import jax.numpy as jnp
from jax.experimental import pallas as pl
from jax.experimental.pallas import tpu as pltpu


def _round_up(n, m):
    return (n + m - 1) // m * m


def gnn_kernel(a_ref, x_ref, sn_ref, dn_ref, w_ref, b_ref, wc_ref, bc_ref,
               z_ref, y_ref, acc_ref):
    k = pl.program_id(1)

    @pl.when(k == 0)
    def _():
        acc_ref[...] = jnp.zeros_like(acc_ref)

    # Weight transform for this k-tile of source nodes (small MXU matmul),
    # then source-side degree normalization.
    h = jnp.dot(x_ref[...], w_ref[...], preferred_element_type=jnp.float32)
    h = h * sn_ref[...]                                   # (TK, Hp)

    # Aggregation: a_ref block is (TK, TM) -- rows = source nodes (k-tile),
    # cols = destination nodes (i-tile).  Contract dim 0 of both operands so
    # the MXU is fed directly with no transpose copy.
    acc_ref[...] += jax.lax.dot_general(
        a_ref[...], h.astype(jnp.bfloat16),
        dimension_numbers=(((0,), (0,)), ((), ())),
        preferred_element_type=jnp.float32)               # (TM, Hp) f32 acc

    @pl.when(k == pl.num_programs(1) - 1)
    def _():
        # Destination-side normalization + bias.
        z = acc_ref[...] * dn_ref[...] + b_ref[...]       # (TM, Hp)
        z_ref[...] = z
        # Classifier Linear(nhid, 1) fused as a lane reduction (VPU/XLU),
        # avoiding a lane-width-1 MXU matmul and a second read of z.
        y_ref[...] = (jnp.sum(z * wc_ref[...], axis=-1, keepdims=True)
                      + bc_ref[0, 0])


def gnn_forward(adj, x, w, b, wc, bc, *, tm=128, tk=128):
    """FairAC GNN forward (GCN body + linear classifier).

    adj: [N, N] dense adjacency (adj[u, v] = 1 for edge u -> v), float32
    x:   [N, F] node features
    w:   [F, H] GraphConv weight;  b: [1, H] GraphConv bias
    wc:  [H, 1] classifier weight (already transposed); bc: [1, 1] bias
    Returns (z [N, H], y [N, 1]).
    """
    N, F = x.shape
    H = w.shape[1]

    LANE = 128
    Fp = _round_up(F, LANE)
    Hp = _round_up(H, LANE)
    Np = _round_up(N, max(tm, tk))

    # Degree norms (DGL GraphConv norm='both', degree clamp(min=1)),
    # precomputed once outside the kernel.
    out_deg = jnp.maximum(jnp.sum(adj, axis=1, keepdims=True), 1.0)   # [N, 1]
    in_deg = jnp.maximum(jnp.sum(adj, axis=0)[:, None], 1.0)          # [N, 1]
    src_norm = jax.lax.rsqrt(out_deg)
    dst_norm = jax.lax.rsqrt(in_deg)

    # Lane-dense, tile-aligned padding.  A is 0/1 so bf16 is exact and halves
    # traffic on the dominant stream; padded rows/cols are zero so they do not
    # perturb real nodes and the padded outputs are sliced off below.
    a_p = jnp.zeros((Np, Np), jnp.bfloat16).at[:N, :N].set(
        adj.astype(jnp.bfloat16))
    x_p = jnp.zeros((Np, Fp), jnp.float32).at[:N, :F].set(x)
    sn_p = jnp.ones((Np, 1), jnp.float32).at[:N, :].set(src_norm)
    dn_p = jnp.ones((Np, 1), jnp.float32).at[:N, :].set(dst_norm)
    w_p = jnp.zeros((Fp, Hp), jnp.float32).at[:F, :H].set(w)
    b_p = jnp.zeros((1, Hp), jnp.float32).at[:, :H].set(b)
    wc_p = jnp.zeros((1, Hp), jnp.float32).at[0, :H].set(wc[:, 0])
    bc_p = bc.reshape(1, 1).astype(jnp.float32)

    grid = (Np // tm, Np // tk)   # (output-row tiles, reduction tiles)

    z_p, y_p = pl.pallas_call(
        gnn_kernel,
        out_shape=(
            jax.ShapeDtypeStruct((Np, Hp), jnp.float32),
            jax.ShapeDtypeStruct((Np, 1), jnp.float32),
        ),
        grid_spec=pltpu.PrefetchScalarGridSpec(
            num_scalar_prefetch=0,
            grid=grid,
            in_specs=[
                # A tile (TK, TM): rows = source (k-tile), cols = dest (i-tile).
                pl.BlockSpec((tk, tm), lambda i, k: (k, i)),
                pl.BlockSpec((tk, Fp), lambda i, k: (k, 0)),    # X k-tile
                pl.BlockSpec((tk, 1), lambda i, k: (k, 0)),     # src norm
                pl.BlockSpec((tm, 1), lambda i, k: (i, 0)),     # dst norm
                pl.BlockSpec((Fp, Hp), lambda i, k: (0, 0)),    # W (resident)
                pl.BlockSpec((1, Hp), lambda i, k: (0, 0)),     # b
                pl.BlockSpec((1, Hp), lambda i, k: (0, 0)),     # wc row
                pl.BlockSpec(memory_space=pltpu.MemorySpace.SMEM),  # bc scalar
            ],
            out_specs=(
                pl.BlockSpec((tm, Hp), lambda i, k: (i, 0)),    # z
                pl.BlockSpec((tm, 1), lambda i, k: (i, 0)),     # y
            ),
            scratch_shapes=[pltpu.VMEM((tm, Hp), jnp.float32)],
        ),
        compiler_params=pltpu.CompilerParams(
            dimension_semantics=("parallel", "arbitrary"),
            vmem_limit_bytes=32 * 1024 * 1024,
        ),
    )(a_p, x_p, sn_p, dn_p, w_p, b_p, wc_p, bc_p)

    return z_p[:N, :H], y_p[:N, :]


if __name__ == "__main__":
    N, NFEAT, NHID = 200, 32, 32   # small shapes (nhid = args.num_hidden = 32)

    key = jax.random.PRNGKey(0)
    k_adj, k_x, k_w, k_b, k_wc, k_bc = jax.random.split(key, 6)

    # Random symmetric adjacency with self-loops (dense graph representation).
    rand = jax.random.uniform(k_adj, (N, N))
    adj = (rand + rand.T > 1.6).astype(jnp.float32)
    adj = jnp.maximum(adj, jnp.eye(N, dtype=jnp.float32))

    x = jax.random.normal(k_x, (N, NFEAT), dtype=jnp.float32)

    # Parameters (shapes per GraphConv(nfeat, nhid) + Linear(nhid, 1)).
    w = jax.random.normal(k_w, (NFEAT, NHID), dtype=jnp.float32) * 0.1
    b = jax.random.normal(k_b, (1, NHID), dtype=jnp.float32) * 0.1
    wc = jax.random.normal(k_wc, (NHID, 1), dtype=jnp.float32) * 0.1
    bc = jax.random.normal(k_bc, (1, 1), dtype=jnp.float32) * 0.1

    gnn_forward_jit = jax.jit(gnn_forward)
    z, y = gnn_forward_jit(adj, x, w, b, wc, bc)
    jax.block_until_ready((z, y))

    # Pure-JAX f32 reference.  The kernel does the aggregation matmul in bf16
    # (exact for A, rounded h) with f32 accumulation, so compare with a
    # tolerance appropriate for bf16 inputs.
    out_deg = jnp.maximum(adj.sum(1, keepdims=True), 1.0)
    in_deg = jnp.maximum(adj.sum(0)[:, None], 1.0)
    h_ref = (x @ w) * jax.lax.rsqrt(out_deg)
    z_ref = (adj.T @ h_ref) * jax.lax.rsqrt(in_deg) + b
    y_ref = z_ref @ wc + bc

    assert z.shape == (N, NHID) and y.shape == (N, 1)
    assert jnp.allclose(z, z_ref, atol=5e-2, rtol=5e-2), "z mismatch"
    assert jnp.allclose(y, y_ref, atol=5e-2, rtol=5e-2), "y mismatch"

    print("KERNEL_OK")
</pallas_src>

<mosaic_0001>
module attributes {stable_mosaic.version = 11 : i64} {
  func.func @gnn_kernel(%arg0: i32, %arg1: i32, %arg2: memref<128x128xbf16, #tpu.memory_space<vmem>>, %arg3: memref<128x128xf32, #tpu.memory_space<vmem>>, %arg4: memref<128x1xf32, #tpu.memory_space<vmem>>, %arg5: memref<128x1xf32, #tpu.memory_space<vmem>>, %arg6: memref<128x128xf32, #tpu.memory_space<vmem>>, %arg7: memref<1x128xf32, #tpu.memory_space<vmem>>, %arg8: memref<1x128xf32, #tpu.memory_space<vmem>>, %arg9: memref<1x1xf32, #tpu.memory_space<smem>>, %arg10: memref<128x128xf32, #tpu.memory_space<vmem>>, %arg11: memref<128x1xf32, #tpu.memory_space<vmem>>, %arg12: memref<128x128xf32, #tpu.memory_space<vmem>>) attributes {dimension_semantics = [#tpu.dimension_semantics<parallel>, #tpu.dimension_semantics<arbitrary>], iteration_bounds = array<i64: 2, 2>, scalar_prefetch = 0 : i64, scratch_operands = 1 : i64, tpu.core_type = #tpu.core_type<tc>, window_params = [{transform_indices = @transform_0, window_bounds = array<i64: 128, 128>}, {transform_indices = @transform_1, window_bounds = array<i64: 128, 128>}, {transform_indices = @transform_2, window_bounds = array<i64: 128, 1>}, {transform_indices = @transform_3, window_bounds = array<i64: 128, 1>}, {pipeline_mode = #tpu.pipeline_mode<synchronous>, transform_indices = @transform_4, window_bounds = array<i64: 128, 128>}, {pipeline_mode = #tpu.pipeline_mode<synchronous>, transform_indices = @transform_5, window_bounds = array<i64: 1, 128>}, {pipeline_mode = #tpu.pipeline_mode<synchronous>, transform_indices = @transform_6, window_bounds = array<i64: 1, 128>}, {transform_indices = @transform_7, window_bounds = array<i64: 1, 1>}, {transform_indices = @transform_8, window_bounds = array<i64: 128, 128>}, {transform_indices = @transform_9, window_bounds = array<i64: 128, 1>}]} {
    %c0_i32 = arith.constant 0 : i32
    %0 = arith.cmpi eq, %arg1, %c0_i32 : i32
    %1 = arith.extui %0 : i1 to i32
    %c0_i32_0 = arith.constant 0 : i32
    %2 = arith.cmpi ne, %1, %c0_i32_0 : i32
    scf.if %2 {
      %cst_14 = arith.constant 0.000000e+00 : f32
      %18 = vector.broadcast %cst_14 : f32 to vector<128x128xf32>
      %c0_15 = arith.constant 0 : index
      %c0_16 = arith.constant 0 : index
      %19 = vector.load %arg12[%c0_15, %c0_16] : memref<128x128xf32, #tpu.memory_space<vmem>>, vector<128x128xf32>
      tpu.vector_store %arg12[%c0_15, %c0_16], %18 {strides = array<i32>} : memref<128x128xf32, #tpu.memory_space<vmem>>, vector<128x128xf32>,
    } else {
    }
    %c0 = arith.constant 0 : index
    %c0_1 = arith.constant 0 : index
    %3 = vector.load %arg3[%c0, %c0_1] : memref<128x128xf32, #tpu.memory_space<vmem>>, vector<128x128xf32>
    %c0_2 = arith.constant 0 : index
    %c0_3 = arith.constant 0 : index
    %4 = vector.load %arg6[%c0_2, %c0_3] : memref<128x128xf32, #tpu.memory_space<vmem>>, vector<128x128xf32>
    %cst = arith.constant dense<0.000000e+00> : vector<128x128xf32>
    %5 = tpu.matmul %3, %4, %cst {dimension_numbers = #tpu.dot_dimension_numbers<[1], [0], [0], [1], [0, 0, 1, 1], [], []>} : vector<128x128xf32>, vector<128x128xf32>, vector<128x128xf32> -> vector<128x128xf32>
    %c0_4 = arith.constant 0 : index
    %c0_5 = arith.constant 0 : index
    %6 = vector.load %arg4[%c0_4, %c0_5] : memref<128x1xf32, #tpu.memory_space<vmem>>, vector<128x1xf32>
    %7 = vector.broadcast %6 : vector<128x1xf32> to vector<128x128xf32>
    %8 = arith.mulf %5, %7 : vector<128x128xf32>
    %c0_6 = arith.constant 0 : index
    %c0_7 = arith.constant 0 : index
    %9 = vector.load %arg12[%c0_6, %c0_7] : memref<128x128xf32, #tpu.memory_space<vmem>>, vector<128x128xf32>
    %c0_8 = arith.constant 0 : index
    %c0_9 = arith.constant 0 : index
    %10 = vector.load %arg2[%c0_8, %c0_9] : memref<128x128xbf16, #tpu.memory_space<vmem>>, vector<128x128xbf16>
    %11 = arith.truncf %8 : vector<128x128xf32> to vector<128x128xbf16>
    %cst_10 = arith.constant dense<0.000000e+00> : vector<128x128xf32>
    %12 = tpu.matmul %10, %11, %cst_10 {dimension_numbers = #tpu.dot_dimension_numbers<[0], [0], [1], [1], [0, 1, 1, 1], [], []>} : vector<128x128xbf16>, vector<128x128xbf16>, vector<128x128xf32> -> vector<128x128xf32>
    %13 = arith.addf %9, %12 : vector<128x128xf32>
    %c0_11 = arith.constant 0 : index
    %c0_12 = arith.constant 0 : index
    %14 = vector.load %arg12[%c0_11, %c0_12] : memref<128x128xf32, #tpu.memory_space<vmem>>, vector<128x128xf32>
    tpu.vector_store %arg12[%c0_11, %c0_12], %13 {strides = array<i32>} : memref<128x128xf32, #tpu.memory_space<vmem>>, vector<128x128xf32>,
    %c1_i32 = arith.constant 1 : i32
    %15 = arith.cmpi eq, %arg1, %c1_i32 : i32
    %16 = arith.extui %15 : i1 to i32
    %c0_i32_13 = arith.constant 0 : i32
    %17 = arith.cmpi ne, %16, %c0_i32_13 : i32
    scf.if %17 {
      %c0_14 = arith.constant 0 : index
      %c0_15 = arith.constant 0 : index
      %18 = vector.load %arg12[%c0_14, %c0_15] : memref<128x128xf32, #tpu.memory_space<vmem>>, vector<128x128xf32>
      %c0_16 = arith.constant 0 : index
      %c0_17 = arith.constant 0 : index
      %19 = vector.load %arg5[%c0_16, %c0_17] : memref<128x1xf32, #tpu.memory_space<vmem>>, vector<128x1xf32>
      %20 = vector.broadcast %19 : vector<128x1xf32> to vector<128x128xf32>
      %21 = arith.mulf %18, %20 : vector<128x128xf32>
      %c0_18 = arith.constant 0 : index
      %c0_19 = arith.constant 0 : index
      %22 = vector.load %arg7[%c0_18, %c0_19] : memref<1x128xf32, #tpu.memory_space<vmem>>, vector<1x128xf32>
      %23 = vector.broadcast %22 : vector<1x128xf32> to vector<128x128xf32>
      %24 = arith.addf %21, %23 : vector<128x128xf32>
      %c0_20 = arith.constant 0 : index
      %c0_21 = arith.constant 0 : index
      %25 = vector.load %arg10[%c0_20, %c0_21] : memref<128x128xf32, #tpu.memory_space<vmem>>, vector<128x128xf32>
      tpu.vector_store %arg10[%c0_20, %c0_21], %24 {strides = array<i32>} : memref<128x128xf32, #tpu.memory_space<vmem>>, vector<128x128xf32>,
      %c0_22 = arith.constant 0 : index
      %c0_23 = arith.constant 0 : index
      %26 = vector.load %arg8[%c0_22, %c0_23] : memref<1x128xf32, #tpu.memory_space<vmem>>, vector<1x128xf32>
      %27 = vector.broadcast %26 : vector<1x128xf32> to vector<128x128xf32>
      %28 = arith.mulf %24, %27 : vector<128x128xf32>
      %cst_24 = arith.constant dense<0.000000e+00> : vector<128xf32>
      %29 = vector.multi_reduction <add>, %28, %cst_24 [1] : vector<128x128xf32> to vector<128xf32>
      %30 = vector.shape_cast %29 : vector<128xf32> to vector<128x1xf32>
      %c0_25 = arith.constant 0 : index
      %c0_26 = arith.constant 0 : index
      %31 = memref.load %arg9[%c0_25, %c0_26] : memref<1x1xf32, #tpu.memory_space<smem>>
      %32 = vector.broadcast %31 : f32 to vector<128x1xf32>
      %33 = arith.addf %30, %32 : vector<128x1xf32>
      %c0_27 = arith.constant 0 : index
      %c0_28 = arith.constant 0 : index
      %34 = vector.load %arg11[%c0_27, %c0_28] : memref<128x1xf32, #tpu.memory_space<vmem>>, vector<128x1xf32>
      tpu.vector_store %arg11[%c0_27, %c0_28], %33 {strides = array<i32>} : memref<128x1xf32, #tpu.memory_space<vmem>>, vector<128x1xf32>,
    } else {
    }
    return
  }
  func.func @transform_0(%arg0: i32, %arg1: i32) -> (i32, i32) {
    %c0_i32 = arith.constant 0 : i32
    return %arg1, %arg0 : i32, i32
  }
  func.func @transform_1(%arg0: i32, %arg1: i32) -> (i32, i32) {
    %c0_i32 = arith.constant 0 : i32
    %c0_i32_0 = arith.constant 0 : i32
    return %arg1, %c0_i32 : i32, i32
  }
  func.func @transform_2(%arg0: i32, %arg1: i32) -> (i32, i32) {
    %c0_i32 = arith.constant 0 : i32
    %c0_i32_0 = arith.constant 0 : i32
    return %arg1, %c0_i32 : i32, i32
  }
  func.func @transform_3(%arg0: i32, %arg1: i32) -> (i32, i32) {
    %c0_i32 = arith.constant 0 : i32
    %c0_i32_0 = arith.constant 0 : i32
    return %arg0, %c0_i32 : i32, i32
  }
  func.func @transform_4(%arg0: i32, %arg1: i32) -> (i32, i32) {
    %c0_i32 = arith.constant 0 : i32
    %c0_i32_0 = arith.constant 0 : i32
    %c0_i32_1 = arith.constant 0 : i32
    return %c0_i32, %c0_i32_0 : i32, i32
  }
  func.func @transform_5(%arg0: i32, %arg1: i32) -> (i32, i32) {
    %c0_i32 = arith.constant 0 : i32
    %c0_i32_0 = arith.constant 0 : i32
    %c0_i32_1 = arith.constant 0 : i32
    return %c0_i32, %c0_i32_0 : i32, i32
  }
  func.func @transform_6(%arg0: i32, %arg1: i32) -> (i32, i32) {
    %c0_i32 = arith.constant 0 : i32
    %c0_i32_0 = arith.constant 0 : i32
    %c0_i32_1 = arith.constant 0 : i32
    return %c0_i32, %c0_i32_0 : i32, i32
  }
  func.func @transform_7(%arg0: i32, %arg1: i32) -> (i32, i32) {
    %c0_i32 = arith.constant 0 : i32
    %c0_i32_0 = arith.constant 0 : i32
    %c0_i32_1 = arith.constant 0 : i32
    return %c0_i32, %c0_i32_0 : i32, i32
  }
  func.func @transform_8(%arg0: i32, %arg1: i32) -> (i32, i32) {
    %c0_i32 = arith.constant 0 : i32
    %c0_i32_0 = arith.constant 0 : i32
    return %arg0, %c0_i32 : i32, i32
  }
  func.func @transform_9(%arg0: i32, %arg1: i32) -> (i32, i32) {
    %c0_i32 = arith.constant 0 : i32
    %c0_i32_0 = arith.constant 0 : i32
    return %arg0, %c0_i32 : i32, i32
  }
}

</mosaic_0001>

<bundles_post_ra>
// kernel: gnn_forward.1
= control target key start
LH: loop header
LB: loop body
LE: loop exit
PB: predicated region body
PF: predicated region fallthrough
CT: control target
= control target key end

     0   :  { %s2167_s0 = inlined_call_operand.vmem [shape: bf16[256,256], index: 0, kind: input, shape index: {}]   ;;  %s2168_s1 = inlined_call_operand.vmem [shape: f32[256,128], index: 1, kind: input, shape index: {}]   ;;  %s2169_s2 = inlined_call_operand.vmem [shape: f32[256,1], index: 2, kind: input, shape index: {}]   ;;  %s2170_s3 = inlined_call_operand.vmem [shape: f32[256,1], index: 3, kind: input, shape index: {}]   ;;  %s2171_s4 = inlined_call_operand.vmem [shape: f32[128,128], index: 4, kind: input, shape index: {}]   ;;  %s2172_s5 = inlined_call_operand.vmem [shape: f32[1,128], index: 5, kind: input, shape index: {}]   ;;  %s2173_s6 = inlined_call_operand.vmem [shape: f32[1,128], index: 6, kind: input, shape index: {}]   ;;  %s2174_s7 = inlined_call_operand.<no memory space> [shape: f32[1,1], index: 7, kind: input, shape index: {}]   ;;  %s2175_s8 = inlined_call_operand.vmem [shape: f32[256,128], index: 8, kind: output, shape index: {0}]   ;;  %s2176_s9 = inlined_call_operand.vmem [shape: f32[256,1], index: 9, kind: output, shape index: {1}]  }
   0x1   :  { %2178 = sst [smem:[#allocation6_spill]] %s2167_s0 }
   0x2   :  { %2179 = sst [smem:[#allocation7_spill]] %s2168_s1 }
   0x3   :  { %15 = sst [smem:[#allocation3]] %s2174_s7 }
   0x4   :  { %s1840_s11 = smov 0   ;;  %s1842_s12 = smov 0  }
   0x5   :  { %s1844_s13 = smov 0   ;;  %s1846_s14 = smov 0  }
   0x6   :  { %s1848_s15 = smov 0   ;;  %s1850_s16 = smov 0  }
   0x7   :  { %s1852_s17 = smov 0  }
   0x8 LB: > { %s30_s7 = sadd.s32 1, %s1774_s15  ;;  %s33_s18 = sadd.s32 1, %s1778_s16  ;;  %s1782_s17 = sphi %s1852_s17, %s21_s17   ;;  %s1778_s16 = sphi %s1850_s16, %s2189_s16   ;;  %s1774_s15 = sphi %s1848_s15, %s2188_s15   ;;  %s1770_s14 = sphi %s1846_s14, %s2187_s14   ;;  %s1766_s13 = sphi %s1844_s13, %s2186_s13   ;;  %s1762_s12 = sphi %s1842_s12, %s2185_s12   ;;  %s1758_s11 = sphi %s1840_s11, %s2184_s11  }
   0x9   : > { %p31_p0 = scmp.ge.s32.totalorder %s30_s7, 2  ;;  %p49_p1 = scmp.ne.s32.totalorder %s1762_s12, %s1758_s11 }
   0xa   : > { %p50_p2 = scmp.eq.s32.totalorder %s1782_s17, 0  ;;  %s42_s22 = sadd.s32 1, %s1762_s12 }
   0xb   : > { %s2191_s7 = smov (%p31_p0, %s30_s7), 0  ;;  %s2193_s18 = smov (!%p31_p0, %s33_s18), %s1778_s16 }
   0xc   : > { %p51_p3 = por %p50_p2, %p49_p1  ;;  %p35_p4 = scmp.ge.s32.totalorder %s2193_s18, 2 }
   0xd   : > { %s37_s19 = ssub.s32 %s1774_s15, %s2191_s7  ;;  %p1489_p6 = scmp.ge.s32.totalorder %s1782_s17, 4 }
   0xe   : > { %s2195_s18 = smov (%p35_p4, %s2193_s18), 0 }
   0xf   : > { %2180 = sst [smem:[#allocation5_spill]] %s2195_s18  ;;  %s38_s20 = ssub.s32 %s1778_s16, %s2195_s18 }
  0x10   : > { %s39_s21 = sor.u32 %s38_s20, %s37_s19  ;;  %301 = sbr.rel (%p1489_p6) target bundleno = 41 (0x29), region = 32 }
  0x11   : > { %p40_p5 = scmp.eq.s32.totalorder %s39_s21, 0 }
  0x13   : > { %s1891_s23 = scalar_select %p40_p5, %s1762_s12, %s42_s22  }
  0x15   : > { %304 = sbr.rel (!%p51_p3) target bundleno = 41 (0x29), region = 36  ;;  %s306_s24 = sand.u32 (%p51_p3), 1, %s1762_s12  }
  0x16   : > { %s1520_s25 = sshll.u32 (%p51_p3), %s1774_s15, 5  ;;  %s1490_s26 = sshll.u32 (%p51_p3), %s306_s24, 6 }
  0x17   : > { %s311_s27 = sadd.s32 (%p51_p3), %s1778_s16, %s1520_s25  ;;  %s2181_s0 = sld [smem:[#allocation6_spill]] (%p51_p3) }
  0x18   : > { %s1493_s28 = sshll.u32 (%p51_p3), %s311_s27, 2  ;;  %s308_s19 = scalar_lea.vmem (%p51_p3), [#allocation4], %s1490_s26 }
  0x1d   : > { %s1900_s10 = scalar_lea.vmem %s2181_s0, %s1493_s28 }
  0x1e   : > { %v330_v0 = vld [vmem:[%s1900_s10] sm:$0xf]  ;;  %v332_v1 = vld [vmem:[%s1900_s10 + $0x8] sm:$0xf]  ;;  %v334_v2 = vld [vmem:[%s1900_s10 + $0x10] sm:$0xf] }
  0x1f   : > { %331 = vst [vmem:[%s308_s19] sm:$0xf] %v330_v0  ;;  %333 = vst [vmem:[%s308_s19 + $0x4] sm:$0xf] %v332_v1  ;;  %v336_v3 = vld [vmem:[%s1900_s10 + $0x18] sm:$0xf] }
  0x20   : > { %335 = vst [vmem:[%s308_s19 + $0x8] sm:$0xf] %v334_v2  ;;  %v338_v4 = vld [vmem:[%s1900_s10 + $0x20] sm:$0xf]  ;;  %v340_v5 = vld [vmem:[%s1900_s10 + $0x28] sm:$0xf] }
  0x21   : > { %337 = vst [vmem:[%s308_s19 + $0xc] sm:$0xf] %v336_v3  ;;  %339 = vst [vmem:[%s308_s19 + $0x10] sm:$0xf] %v338_v4  ;;  %v342_v6 = vld [vmem:[%s1900_s10 + $0x30] sm:$0xf] }
  0x22   : > { %341 = vst [vmem:[%s308_s19 + $0x14] sm:$0xf] %v340_v5  ;;  %v344_v7 = vld [vmem:[%s1900_s10 + $0x38] sm:$0xf]  ;;  %v346_v8 = vld [vmem:[%s1900_s10 + $0x40] sm:$0xf] }
  0x23   : > { %343 = vst [vmem:[%s308_s19 + $0x18] sm:$0xf] %v342_v6  ;;  %345 = vst [vmem:[%s308_s19 + $0x1c] sm:$0xf] %v344_v7  ;;  %v348_v9 = vld [vmem:[%s1900_s10 + $0x48] sm:$0xf] }
  0x24   : > { %347 = vst [vmem:[%s308_s19 + $0x20] sm:$0xf] %v346_v8  ;;  %v350_v10 = vld [vmem:[%s1900_s10 + $0x50] sm:$0xf]  ;;  %v352_v11 = vld [vmem:[%s1900_s10 + $0x58] sm:$0xf] }
  0x25   : > { %349 = vst [vmem:[%s308_s19 + $0x24] sm:$0xf] %v348_v9  ;;  %351 = vst [vmem:[%s308_s19 + $0x28] sm:$0xf] %v350_v10  ;;  %v354_v12 = vld [vmem:[%s1900_s10 + $0x60] sm:$0xf] }
  0x26   : > { %353 = vst [vmem:[%s308_s19 + $0x2c] sm:$0xf] %v352_v11  ;;  %v356_v13 = vld [vmem:[%s1900_s10 + $0x68] sm:$0xf]  ;;  %v358_v14 = vld [vmem:[%s1900_s10 + $0x70] sm:$0xf] }
  0x27   : > { %355 = vst [vmem:[%s308_s19 + $0x30] sm:$0xf] %v354_v12  ;;  %357 = vst [vmem:[%s308_s19 + $0x34] sm:$0xf] %v356_v13  ;;  %v360_v15 = vld [vmem:[%s1900_s10 + $0x78] sm:$0xf] }
  0x28   : > { %359 = vst [vmem:[%s308_s19 + $0x38] sm:$0xf] %v358_v14  ;;  %361 = vst [vmem:[%s308_s19 + $0x3c] sm:$0xf] %v360_v15 }
  0x29 PF: > { %p1494_p7 = scmp.ge.s32.totalorder %s1782_s17, 1  ;;  %p443_p8 = scmp.lt.s32.totalorder %s1782_s17, 5 }
  0x2b   : > { %p444_p9 = pnand %p1494_p7, %p443_p8 }
  0x2c   : > { %s450_s20 = sand.u32 (!%p444_p9), 1, %s1758_s11   ;;  %s1496_s21 = sshll.u32 (!%p444_p9), %s1766_s13, 4 }
  0x2d   : > { %447 = sbr.rel (%p444_p9) target bundleno = 891 (0x37b), region = 89  ;;  %s1495_s22 = sshll.u32 (!%p444_p9), %s450_s20, 6 }
  0x2e   : > { %p507_p10 = scmp.lt.s32.totalorder (!%p444_p9), %s1496_s21, 31  ;;  %s1500_s24 = sshll.u32 (!%p444_p9), %s1770_s14, 4 }
  0x2f   : > { %p519_p11 = scmp.lt.s32.totalorder (!%p444_p9), %s1500_s24, 31  ;;  %s2182_s1 = sld [smem:[#allocation7_spill]] (!%p444_p9) }
  0x30   : > { %s1948_s29 = scalar_lea.vmem (!%p444_p9), [#allocation4], %s1495_s22  ;;  %p1506_p12 = scmp.ne.s32.totalorder (!%p444_p9), %s1766_s13, 0 }
  0x32   : > { %s2197_s21 = smov (!%p507_p10, %s1496_s21), 31  ;;  %s2199_s24 = smov (!%p519_p11, %s1500_s24), 31 }
  0x33   : > { %s1497_s25 = sshll.u32 %s2197_s21, 3  ;;  %s1501_s19 = sshll.u32 %s2199_s24, 3 }
  0x34   : > { %s1931_s10 = scalar_lea.vmem %s2169_s2, %s1497_s25  ;;  %s1936_s20 = scalar_lea.vmem %s2170_s3, %s1501_s19 }
  0x35   : > { %s1926_s28 = scalar_lea.vmem %s2182_s1, %s1497_s25  ;;  %s1941_s21 = scalar_lea.vmem %s2175_s8, %s1501_s19 }
  0x36   : > { %s1946_s1 = scalar_lea.vmem %s2176_s9, %s1501_s19  ;;  %540 = sbr.rel (%p1506_p12) target bundleno = 68 (0x44), region = 97 }
  0x3b   : > { %v1784_v16 = vmov 0.0  }
  0x3c   : > { %541 = vst [vmem:[#allocation2 + $0x30] sm:$0xff] %v1784_v16  ;;  %542 = vst [vmem:[#allocation2] sm:$0xff] %v1784_v16 }
  0x3d   : > { %543 = vst [vmem:[#allocation2 + $0x58] sm:$0xff] %v1784_v16  ;;  %544 = vst [vmem:[#allocation2 + $0x18] sm:$0xff] %v1784_v16 }
  0x3e   : > { %545 = vst [vmem:[#allocation2 + $0x50] sm:$0xff] %v1784_v16  ;;  %546 = vst [vmem:[#allocation2 + $0x68] sm:$0xff] %v1784_v16 }
  0x3f   : > { %547 = vst [vmem:[#allocation2 + $0x8] sm:$0xff] %v1784_v16  ;;  %548 = vst [vmem:[#allocation2 + $0x48] sm:$0xff] %v1784_v16 }
  0x40   : > { %549 = vst [vmem:[#allocation2 + $0x40] sm:$0xff] %v1784_v16  ;;  %550 = vst [vmem:[#allocation2 + $0x20] sm:$0xff] %v1784_v16 }
  0x41   : > { %551 = vst [vmem:[#allocation2 + $0x10] sm:$0xff] %v1784_v16  ;;  %552 = vst [vmem:[#allocation2 + $0x38] sm:$0xff] %v1784_v16 }
  0x42   : > { %553 = vst [vmem:[#allocation2 + $0x60] sm:$0xff] %v1784_v16  ;;  %554 = vst [vmem:[#allocation2 + $0x70] sm:$0xff] %v1784_v16 }
  0x43   : > { %555 = vst [vmem:[#allocation2 + $0x78] sm:$0xff] %v1784_v16  ;;  %556 = vst [vmem:[#allocation2 + $0x28] sm:$0xff] %v1784_v16 }
  0x44 PF: > { %v588_v17 = vld [vmem:[%s2171_s4 + $0x78] sm:$0xff]  ;;  %v587_v18 = vld [vmem:[%s2171_s4 + $0x70] sm:$0xff]  ;;  %v1785_v19 = vmov 0   ;;  %v586_v20 = vld [vmem:[%s2171_s4 + $0x68] sm:$0xff]  ;;  %p1515_p13 = scmp.ne.s32.totalorder %s1766_s13, 1 }
  0x45   : > { %1569 = vmatprep.subr.mxu0 %v588_v17  ;;  %1717 = vset.pattern.permute.xlu1 %v1785_v19  ;;  %v585_v21 = vld [vmem:[%s2171_s4 + $0x60] sm:$0xff]  ;;  %v584_v23 = vld [vmem:[%s2171_s4 + $0x58] sm:$0xff]  ;;  %v583_v24 = vld [vmem:[%s2171_s4 + $0x50] sm:$0xff] }
  0x46   : > { %1570 = vmatpush3.msra.mxu0 %v588_v17  ;;  %1716 = vset.pattern.permute.xlu0 %v1785_v19  ;;  %v557_v22 = vld [vmem:[%s1926_s28] sm:$0xff]  ;;  %v582_v25 = vld [vmem:[%s2171_s4 + $0x48] sm:$0xff]  ;;  %v748_v27 = vld [vmem:[%s1931_s10 + $0x70] sm:$0xff] }
  0x47   : > { %1571 = vmatprep.subr.mxu0 %v587_v18  ;;  %1601 = vmatprep.mubr.f32.mxu0 %v557_v22  ;;  %v746_v26 = vld [vmem:[%s1931_s10 + $0x60] sm:$0xff]  ;;  %v747_v29 = vld [vmem:[%s1931_s10 + $0x68] sm:$0xff]  ;;  %v749_v30 = vld [vmem:[%s1931_s10 + $0x78] sm:$0xff] }
  0x48   : > { %1572 = vmatpush3.msra.mxu0 %v587_v18  ;;  %812 = vperm.xlu1 %1717, %v746_v26   ;;  %v581_v28 = vld [vmem:[%s2171_s4 + $0x40] sm:$0xff]  ;;  %v580_v31 = vld [vmem:[%s2171_s4 + $0x38] sm:$0xff]  ;;  %v579_v32 = vld [vmem:[%s2171_s4 + $0x30] sm:$0xff] }
  0x49   : > { %1573 = vmatprep.subr.mxu0 %v586_v20  ;;  %822 = vperm.xlu0 %1716, %v748_v27   ;;  %v745_v33 = vld [vmem:[%s1931_s10 + $0x58] sm:$0xff]  ;;  %v744_v34 = vld [vmem:[%s1931_s10 + $0x50] sm:$0xff]  ;;  %v578_v35 = vld [vmem:[%s2171_s4 + $0x28] sm:$0xff] }
  0x4a   : > { %1574 = vmatpush3.msra.mxu0 %v586_v20  ;;  %v577_v36 = vld [vmem:[%s2171_s4 + $0x20] sm:$0xff]  ;;  %v743_v37 = vld [vmem:[%s1931_s10 + $0x48] sm:$0xff]  ;;  %v576_v39 = vld [vmem:[%s2171_s4 + $0x18] sm:$0xff] }
  0x4b   : > { %1575 = vmatprep.subr.mxu0 %v585_v21  ;;  %v742_v38 = vld [vmem:[%s1931_s10 + $0x40] sm:$0xff]  ;;  %v575_v40 = vld [vmem:[%s2171_s4 + $0x10] sm:$0xff]  ;;  %v741_v41 = vld [vmem:[%s1931_s10 + $0x38] sm:$0xff] }
  0x4c   : > { %1576 = vmatpush3.msra.mxu0 %v585_v21  ;;  %817 = vperm.xlu1 %1717, %v747_v29   ;;  %v740_v42 = vld [vmem:[%s1931_s10 + $0x30] sm:$0xff]  ;;  %v574_v43 = vld [vmem:[%s2171_s4 + $0x8] sm:$0xff]  ;;  %v573_v44 = vld [vmem:[%s2171_s4] sm:$0xff] }
  0x4d   : > { %1577 = vmatprep.subr.mxu0 %v584_v23  ;;  %827 = vperm.xlu0 %1716, %v749_v30   ;;  %v739_v45 = vld [vmem:[%s1931_s10 + $0x28] sm:$0xff]  ;;  %v738_v46 = vld [vmem:[%s1931_s10 + $0x20] sm:$0xff]  ;;  %v559_v48 = vld [vmem:[%s1926_s28 + $0x10] sm:$0xff] }
  0x4e   : > { %1578 = vmatpush3.msra.mxu0 %v584_v23  ;;  %v558_v47 = vld [vmem:[%s1926_s28 + $0x8] sm:$0xff]  ;;  %v737_v49 = vld [vmem:[%s1931_s10 + $0x18] sm:$0xff]  ;;  %v736_v50 = vld [vmem:[%s1931_s10 + $0x10] sm:$0xff] }
  0x4f   : > { %1579 = vmatprep.subr.mxu0 %v583_v24  ;;  %v560_v51 = vld [vmem:[%s1926_s28 + $0x18] sm:$0xff]  ;;  %v561_v52 = vld [vmem:[%s1926_s28 + $0x20] sm:$0xff]  ;;  %v735_v53 = vld [vmem:[%s1931_s10 + $0x8] sm:$0xff] }
  0x50   : > { %1580 = vmatpush3.msra.mxu0 %v583_v24  ;;  %807 = vperm.xlu1 %1717, %v745_v33   ;;  %v734_v54 = vld [vmem:[%s1931_s10] sm:$0xff]  ;;  %v562_v55 = vld [vmem:[%s1926_s28 + $0x28] sm:$0xff]  ;;  %v563_v56 = vld [vmem:[%s1926_s28 + $0x30] sm:$0xff] }
  0x51   : > { %1581 = vmatprep.subr.mxu0 %v582_v25  ;;  %802 = vperm.xlu0 %1716, %v744_v34   ;;  %v564_v57 = vld [vmem:[%s1926_s28 + $0x38] sm:$0xff]  ;;  %v565_v58 = vld [vmem:[%s1926_s28 + $0x40] sm:$0xff]  ;;  %v566_v59 = vld [vmem:[%s1926_s28 + $0x48] sm:$0xff] }
  0x52   : > { %1582 = vmatpush3.msra.mxu0 %v582_v25  ;;  %v567_v60 = vld [vmem:[%s1926_s28 + $0x50] sm:$0xff]  ;;  %v568_v61 = vld [vmem:[%s1926_s28 + $0x58] sm:$0xff]  ;;  %v569_v62 = vld [vmem:[%s1926_s28 + $0x60] sm:$0xff] }
  0x53   : > { %1583 = vmatprep.subr.mxu0 %v581_v28  ;;  %v570_v63 = vld [vmem:[%s1926_s28 + $0x68] sm:$0xff]  ;;  %v571_v0 = vld [vmem:[%s1926_s28 + $0x70] sm:$0xff]  ;;  %v572_v1 = vld [vmem:[%s1926_s28 + $0x78] sm:$0xff] }
  0x54   : > { %1584 = vmatpush3.msra.mxu0 %v581_v28  ;;  %797 = vperm.xlu1 %1717, %v743_v37   ;;  %v1718_v2 = vld [vmem:[%s1948_s29] sm:$0xff]   ;;  %v1719_v3 = vld [vmem:[%s1948_s29 + $0x8] sm:$0xff]   ;;  %v1720_v4 = vld [vmem:[%s1948_s29 + $0x10] sm:$0xff]  }
  0x55   : > { %1585 = vmatprep.subr.mxu0 %v580_v31  ;;  %792 = vperm.xlu0 %1716, %v742_v38   ;;  %v1721_v5 = vld [vmem:[%s1948_s29 + $0x18] sm:$0xff]   ;;  %v1722_v6 = vld [vmem:[%s1948_s29 + $0x20] sm:$0xff]   ;;  %v1723_v7 = vld [vmem:[%s1948_s29 + $0x28] sm:$0xff]  }
  0x56   : > { %1586 = vmatpush3.msra.mxu0 %v580_v31  ;;  %v1724_v8 = vld [vmem:[%s1948_s29 + $0x30] sm:$0xff]   ;;  %v1725_v9 = vld [vmem:[%s1948_s29 + $0x38] sm:$0xff]  }
  0x57   : > { %1587 = vmatprep.subr.mxu0 %v579_v32 }
  0x58   : > { %1588 = vmatpush3.msra.mxu0 %v579_v32  ;;  %787 = vperm.xlu1 %1717, %v741_v41  }
  0x59   : > { %1589 = vmatprep.subr.mxu0 %v578_v35  ;;  %782 = vperm.xlu0 %1716, %v740_v42  }
  0x5a   : > { %1590 = vmatpush3.msra.mxu0 %v578_v35 }
  0x5b   : > { %1591 = vmatprep.subr.mxu0 %v577_v36 }
  0x5c   : > { %1592 = vmatpush3.msra.mxu0 %v577_v36  ;;  %777 = vperm.xlu1 %1717, %v739_v45  }
  0x5d   : > { %1593 = vmatprep.subr.mxu0 %v576_v39  ;;  %772 = vperm.xlu0 %1716, %v738_v46  }
  0x5e   : > { %1594 = vmatpush3.msra.mxu0 %v576_v39 }
  0x5f   : > { %1595 = vmatprep.subr.mxu0 %v575_v40 }
  0x60   : > { %1596 = vmatpush3.msra.mxu0 %v575_v40  ;;  %767 = vperm.xlu1 %1717, %v737_v49  }
  0x61   : > { %1597 = vmatprep.subr.mxu0 %v574_v43  ;;  %762 = vperm.xlu0 %1716, %v736_v50  }
  0x62   : > { %1598 = vmatpush3.msra.mxu0 %v574_v43 }
  0x63   : > { %1599 = vmatprep.subr.mxu0 %v573_v44 }
  0x64   : > { %1600 = vmatpush3.msra.mxu0 %v573_v44  ;;  %757 = vperm.xlu1 %1717, %v735_v53  }
  0x65   : > { %1602 = vmatmul.mubr.f32.vlgmr.msra.gmra.mxu0 %v558_v47  ;;  %752 = vperm.xlu0 %1716, %v734_v54  }
  0x66   : > { %1604 = vmatprep.mubr.f32.mxu0 %v559_v48 }
  0x69   : > { %1605 = vmatmul.mubr.f32.gmra.mxu0 %v560_v51 }
  0x6a   : > { %1607 = vmatprep.mubr.f32.mxu0 %v561_v52 }
  0x6d   : > { %1608 = vmatmul.mubr.f32.gmra.mxu0 %v562_v55 }
  0x6e   : > { %1610 = vmatprep.mubr.f32.mxu0 %v563_v56 }
  0x71   : > { %1611 = vmatmul.mubr.f32.gmra.mxu0 %v564_v57 }
  0x72   : > { %1613 = vmatprep.mubr.f32.mxu0 %v565_v58 }
  0x75   : > { %1614 = vmatmul.mubr.f32.gmra.mxu0 %v566_v59 }
  0x76   : > { %1616 = vmatprep.mubr.f32.mxu0 %v567_v60 }
  0x79   : > { %1617 = vmatmul.mubr.f32.gmra.mxu0 %v568_v61 }
  0x7a   : > { %1619 = vmatprep.mubr.f32.mxu0 %v569_v62 }
  0x7d   : > { %1620 = vmatmul.mubr.f32.gmra.mxu0 %v570_v63 }
  0x7e   : > { %1622 = vmatprep.mubr.f32.mxu0 %v571_v0 }
  0x81   : > { %1623 = vmatmul.mubr.f32.gmra.mxu0 %v572_v1 }
  0x83   : > { %934 = vxpose.xlu0.c.b16.start [1/8] %v1718_v2, 128 }
  0x87   : > { %935 = vxpose.xlu0.c.b16.cont [2/8] %v1719_v3, 128 }
  0x8b   : > { %936 = vxpose.xlu0.c.b16.cont [3/8] %v1720_v4, 128 }
  0x8f   : > { %937 = vxpose.xlu0.c.b16.cont [4/8] %v1721_v5, 128 }
  0x93   : > { %938 = vxpose.xlu0.c.b16.cont [5/8] %v1722_v6, 128 }
  0x97   : > { %939 = vxpose.xlu0.c.b16.cont [6/8] %v1723_v7, 128 }
  0x9b   : > { %940 = vxpose.xlu0.c.b16.cont [7/8] %v1724_v8, 128 }
  0x9f   : > { %941 = vxpose.xlu0.c.b16.end [8/8] %v1725_v9, 128 }
  0xc3   : > { %v813_v25 = vpop.permute.xlu1 %812 }
  0xc4   : > { %v823_v10 = vpop.permute.xlu0 %822 }
  0xc7   : > { %v818_v29 = vpop.permute.xlu1 %817 }
  0xc8   : > { %v828_v11 = vpop.permute.xlu0 %827 }
  0xcb   : > { %v808_v33 = vpop.permute.xlu1 %807 }
  0xcc   : > { %v803_v12 = vpop.permute.xlu0 %802 }
  0xcf   : > { %v798_v37 = vpop.permute.xlu1 %797 }
  0xd0   : > { %v793_v13 = vpop.permute.xlu0 %792 }
  0xd3   : > { %v788_v46 = vpop.permute.xlu1 %787 }
  0xd4   : > { %v783_v14 = vpop.permute.xlu0 %782 }
  0xd7   : > { %v778_v51 = vpop.permute.xlu1 %777 }
  0xd8   : > { %v773_v15 = vpop.permute.xlu0 %772 }
  0xdb   : > { %v768_v57 = vpop.permute.xlu1 %767 }
  0xdc   : > { %v763_v16 = vpop.permute.xlu0 %762 }
  0xdf   : > { %v758_v63 = vpop.permute.xlu1 %757 }
  0xe0   : > { %v753_v17 = vpop.permute.xlu0 %752 }
  0xe5   : > { %v942_v18 = vpop.trf.xlu0 }
  0xe6   : > { %1641 = vmatprep.mubr.bf16.mxu1 %v942_v18  ;;  %v847_v18 = vld [vmem:[#allocation2] sm:$0xff] }
  0xe9   : > { %v943_v61 = vpop.trf.xlu0 }
  0xed   : > { %v944_v3 = vpop.trf.xlu0 }
  0xf1   : > { %v945_v5 = vpop.trf.xlu0 }
  0xf5   : > { %v946_v6 = vpop.trf.xlu0 }
  0xf9   : > { %v947_v7 = vpop.trf.xlu0 }
  0xfd   : > { %v948_v8 = vpop.trf.xlu0 }
 0x101   : > { %v949_v9 = vpop.trf.xlu0 }
 0x125   : > { %v1603_v19 = vpop.f32.mrf.mxu0 }
 0x126   : > { %v831_v2 = vmul.f32 %v1603_v19, %v758_v63 }
 0x127   : > { %v655_v20 = vpop.f32.mrf.mxu0 }
 0x128   : > { %v830_v0 = vmul.f32 %v753_v17, %v655_v20 }
 0x129   : > { %v1606_v21 = vpop.f32.mrf.mxu0 }
 0x12a   : > { %v833_v62 = vmul.f32 %v1606_v21, %v768_v57  ;;  %v878_v4 = vpack.c.bf16 %v831_v2, %v830_v0  ;;  %v852_v21 = vld [vmem:[#allocation2 + $0x8] sm:$0xff] }
 0x12b   : > { %v665_v22 = vpop.f32.mrf.mxu0 }
 0x12c   : > { %v832_v59 = vmul.f32 %v763_v16, %v665_v22 }
 0x12d   : > { %v1609_v23 = vpop.f32.mrf.mxu0 }
 0x12e   : > { %v835_v58 = vmul.f32 %v1609_v23, %v778_v51  ;;  %v879_v1 = vpack.c.bf16 %v833_v62, %v832_v59  ;;  %v861_v51 = vld [vmem:[#allocation2 + $0x28] sm:$0xff] }
 0x12f   : > { %v675_v24 = vpop.f32.mrf.mxu0 }
 0x130   : > { %v834_v55 = vmul.f32 %v773_v15, %v675_v24  ;;  %v849_v15 = vld [vmem:[#allocation2 + $0x18] sm:$0xff]  ;;  %v850_v24 = vld [vmem:[#allocation2 + $0x50] sm:$0xff] }
 0x131   : > { %v1612_v26 = vpop.f32.mrf.mxu0 }
 0x132   : > { %v837_v54 = vmul.f32 %v1612_v26, %v788_v46  ;;  %v880_v60 = vpack.c.bf16 %v835_v58, %v834_v55 }
 0x133   : > { %v685_v27 = vpop.f32.mrf.mxu0 }
 0x134   : > { %v836_v52 = vmul.f32 %v783_v14, %v685_v27  ;;  %v853_v27 = vld [vmem:[#allocation2 + $0x48] sm:$0xff] }
 0x135   : > { %v1615_v28 = vpop.f32.mrf.mxu0 }
 0x136   : > { %v839_v50 = vmul.f32 %v1615_v28, %v798_v37  ;;  %v881_v56 = vpack.c.bf16 %v837_v54, %v836_v52  ;;  %v859_v54 = vld [vmem:[#allocation2 + $0x70] sm:$0xff] }
 0x137   : > { %v695_v30 = vpop.f32.mrf.mxu0 }
 0x138   : > { %v838_v48 = vmul.f32 %v793_v13, %v695_v30  ;;  %v851_v30 = vld [vmem:[#allocation2 + $0x68] sm:$0xff] }
 0x139   : > { %v1618_v31 = vpop.f32.mrf.mxu0 }
 0x13a   : > { %v841_v47 = vmul.f32 %v1618_v31, %v808_v33  ;;  %v882_v53 = vpack.c.bf16 %v839_v50, %v838_v48  ;;  %v856_v33 = vld [vmem:[#allocation2 + $0x10] sm:$0xff]  ;;  %v858_v48 = vld [vmem:[#allocation2 + $0x60] sm:$0xff] }
 0x13b   : > { %v705_v32 = vpop.f32.mrf.mxu0 }
 0x13c   : > { %v840_v44 = vmul.f32 %v803_v12, %v705_v32  ;;  %v846_v12 = vld [vmem:[#allocation2 + $0x30] sm:$0xff] }
 0x13d   : > { %v1621_v34 = vpop.f32.mrf.mxu0 }
 0x13e   : > { %v843_v42 = vmul.f32 %v1621_v34, %v818_v29  ;;  %v883_v49 = vpack.c.bf16 %v841_v47, %v840_v44 }
 0x13f   : > { %v715_v35 = vpop.f32.mrf.mxu0 }
 0x140   : > { %v842_v39 = vmul.f32 %v813_v25, %v715_v35 }
 0x141   : > { %v1624_v36 = vpop.f32.mrf.mxu0 }
 0x142   : > { %v845_v40 = vmul.f32 %v1624_v36, %v828_v11  ;;  %v884_v45 = vpack.c.bf16 %v843_v42, %v842_v39  ;;  %v854_v36 = vld [vmem:[#allocation2 + $0x40] sm:$0xff]  ;;  %v857_v39 = vld [vmem:[#allocation2 + $0x38] sm:$0xff] }
 0x143   : > { %v725_v38 = vpop.f32.mrf.mxu0  ;;  %v855_v42 = vld [vmem:[#allocation2 + $0x20] sm:$0xff] }
 0x144   : > { %v844_v41 = vmul.f32 %v823_v10, %v725_v38  ;;  %v848_v10 = vld [vmem:[#allocation2 + $0x58] sm:$0xff] }
 0x146   : > { %v885_v43 = vpack.c.bf16 %v845_v40, %v844_v41 }
 0x148   : > { %1625 = vmatprep.subr.bf16.mxu1 %v885_v43 }
 0x149   : > { %1626 = vmatpush3.bf16.msra.mxu1 %v885_v43 }
 0x14a   : > { %1627 = vmatprep.subr.bf16.mxu1 %v884_v45 }
 0x14d   : > { %1628 = vmatpush3.bf16.msra.mxu1 %v884_v45  ;;  %v860_v45 = vld [vmem:[#allocation2 + $0x78] sm:$0xff] }
 0x14e   : > { %1629 = vmatprep.subr.bf16.mxu1 %v883_v49 }
 0x151   : > { %1630 = vmatpush3.bf16.msra.mxu1 %v883_v49 }
 0x152   : > { %1631 = vmatprep.subr.bf16.mxu1 %v882_v53 }
 0x155   : > { %1632 = vmatpush3.bf16.msra.mxu1 %v882_v53 }
 0x156   : > { %1633 = vmatprep.subr.bf16.mxu1 %v881_v56 }
 0x159   : > { %1634 = vmatpush3.bf16.msra.mxu1 %v881_v56 }
 0x15a   : > { %1635 = vmatprep.subr.bf16.mxu1 %v880_v60 }
 0x15d   : > { %1636 = vmatpush3.bf16.msra.mxu1 %v880_v60 }
 0x15e   : > { %1637 = vmatprep.subr.bf16.mxu1 %v879_v1 }
 0x161   : > { %1638 = vmatpush3.bf16.msra.mxu1 %v879_v1 }
 0x162   : > { %1639 = vmatprep.subr.bf16.mxu1 %v878_v4 }
 0x165   : > { %1640 = vmatpush3.bf16.msra.mxu1 %v878_v4 }
 0x168   : > { %1642 = vmatmul.mubr.bf16.vlgmr.msra.gmra.mxu1 %v943_v61 }
 0x169   : > { %1645 = vmatprep.mubr.bf16.mxu1 %v944_v3 }
 0x170   : > { %1646 = vmatmul.mubr.bf16.gmra.mxu1 %v945_v5 }
 0x171   : > { %1649 = vmatprep.mubr.bf16.mxu1 %v946_v6 }
 0x178   : > { %1650 = vmatmul.mubr.bf16.gmra.mxu1 %v947_v7 }
 0x179   : > { %1653 = vmatprep.mubr.bf16.mxu1 %v948_v8 }
 0x180   : > { %1654 = vmatmul.mubr.bf16.gmra.mxu1 %v949_v9 }
 0x228   : > { %v1643_v11 = vpop.f32.mrf.mxu1 }
 0x229   : > { %v1049_v13 = vadd.f32 %v1643_v11, %v848_v10 }
 0x22a   : > { %v984_v14 = vpop.f32.mrf.mxu1 }
 0x22b   : > { %1065 = vst [vmem:[#allocation2 + $0x58] sm:$0xff] %v1049_v13  ;;  %v1047_v16 = vadd.f32 %v984_v14, %v846_v12 }
 0x22c   : > { %v1644_v17 = vpop.f32.mrf.mxu1 }
 0x22d   : > { %1063 = vst [vmem:[#allocation2 + $0x30] sm:$0xff] %v1047_v16  ;;  %v1050_v19 = vadd.f32 %v1644_v17, %v849_v15 }
 0x22e   : > { %v987_v20 = vpop.f32.mrf.mxu1 }
 0x22f   : > { %1066 = vst [vmem:[#allocation2 + $0x18] sm:$0xff] %v1050_v19  ;;  %v1048_v22 = vadd.f32 %v987_v20, %v847_v18 }
 0x230   : > { %v1647_v23 = vpop.f32.mrf.mxu1 }
 0x231   : > { %1064 = vst [vmem:[#allocation2] sm:$0xff] %v1048_v22  ;;  %v1053_v25 = vadd.f32 %v1647_v23, %v852_v21 }
 0x232   : > { %v1000_v26 = vpop.f32.mrf.mxu1 }
 0x233   : > { %1069 = vst [vmem:[#allocation2 + $0x8] sm:$0xff] %v1053_v25  ;;  %v1051_v28 = vadd.f32 %v1000_v26, %v850_v24 }
 0x234   : > { %v1648_v29 = vpop.f32.mrf.mxu1 }
 0x235   : > { %1067 = vst [vmem:[#allocation2 + $0x50] sm:$0xff] %v1051_v28  ;;  %v1054_v31 = vadd.f32 %v1648_v29, %v853_v27 }
 0x236   : > { %v1003_v32 = vpop.f32.mrf.mxu1 }
 0x237   : > { %1070 = vst [vmem:[#allocation2 + $0x48] sm:$0xff] %v1054_v31  ;;  %v1052_v34 = vadd.f32 %v1003_v32, %v851_v30 }
 0x238   : > { %v1651_v35 = vpop.f32.mrf.mxu1 }
 0x239   : > { %1068 = vst [vmem:[#allocation2 + $0x68] sm:$0xff] %v1052_v34  ;;  %v1057_v37 = vadd.f32 %v1651_v35, %v856_v33 }
 0x23a   : > { %v1016_v38 = vpop.f32.mrf.mxu1 }
 0x23b   : > { %1073 = vst [vmem:[#allocation2 + $0x10] sm:$0xff] %v1057_v37  ;;  %v1055_v40 = vadd.f32 %v1016_v38, %v854_v36 }
 0x23c   : > { %v1652_v41 = vpop.f32.mrf.mxu1 }
 0x23d   : > { %1071 = vst [vmem:[#allocation2 + $0x40] sm:$0xff] %v1055_v40  ;;  %v1058_v43 = vadd.f32 %v1652_v41, %v857_v39 }
 0x23e   : > { %v1019_v44 = vpop.f32.mrf.mxu1 }
 0x23f   : > { %1074 = vst [vmem:[#allocation2 + $0x38] sm:$0xff] %v1058_v43  ;;  %v1056_v46 = vadd.f32 %v1019_v44, %v855_v42 }
 0x240   : > { %v1655_v47 = vpop.f32.mrf.mxu1 }
 0x241   : > { %1072 = vst [vmem:[#allocation2 + $0x20] sm:$0xff] %v1056_v46  ;;  %v1061_v49 = vadd.f32 %v1655_v47, %v860_v45 }
 0x242   : > { %v1032_v50 = vpop.f32.mrf.mxu1 }
 0x243   : > { %1077 = vst [vmem:[#allocation2 + $0x78] sm:$0xff] %v1061_v49  ;;  %v1059_v52 = vadd.f32 %v1032_v50, %v858_v48 }
 0x244   : > { %v1656_v53 = vpop.f32.mrf.mxu1 }
 0x245   : > { %1075 = vst [vmem:[#allocation2 + $0x60] sm:$0xff] %v1059_v52  ;;  %v1062_v55 = vadd.f32 %v1656_v53, %v861_v51  ;;  %1082 = sbr.rel (%p1515_p13) target bundleno = 891 (0x37b), region = 101 }
 0x246   : > { %v1035_v56 = vpop.f32.mrf.mxu1 }
 0x247   : > { %1078 = vst [vmem:[#allocation2 + $0x28] sm:$0xff] %v1062_v55  ;;  %v1060_v57 = vadd.f32 %v1035_v56, %v859_v54 }
 0x249   : > { %1076 = vst [vmem:[#allocation2 + $0x70] sm:$0xff] %v1060_v57 }
 0x24a   : > { %v1101_v58 = vld [vmem:[%s1936_s20 + $0x10] sm:$0xff]  ;;  %v1099_v59 = vld [vmem:[%s1936_s20] sm:$0xff]  ;;  %v1786_v60 = vmov 0   ;;  %v1102_v61 = vld [vmem:[%s1936_s20 + $0x18] sm:$0xff]  ;;  %vm1323_vm0 = vcmask 7168  }
 0x24b   : > { %1727 = vset.pattern.permute.xlu1 %v1786_v60  ;;  %1726 = vset.pattern.permute.xlu0 %v1786_v60  ;;  %v1100_v62 = vld [vmem:[%s1936_s20 + $0x8] sm:$0xff]  ;;  %v1103_v0 = vld [vmem:[%s1936_s20 + $0x20] sm:$0xff]  ;;  %v1106_v1 = vld [vmem:[%s1936_s20 + $0x38] sm:$0xff] }
 0x24c   : > { %1127 = vperm.xlu1 %1727, %v1101_v58   ;;  %1117 = vperm.xlu0 %1726, %v1099_v59   ;;  %v1104_v63 = vld [vmem:[%s1936_s20 + $0x28] sm:$0xff]  ;;  %v1105_v2 = vld [vmem:[%s1936_s20 + $0x30] sm:$0xff]  ;;  %v1107_v4 = vld [vmem:[%s1936_s20 + $0x40] sm:$0xff] }
 0x24d   : > { %v1108_v3 = vld [vmem:[%s1936_s20 + $0x48] sm:$0xff]  ;;  %v1110_v5 = vld [vmem:[%s1936_s20 + $0x58] sm:$0xff]  ;;  %v1109_v6 = vld [vmem:[%s1936_s20 + $0x50] sm:$0xff] }
 0x24e   : > { %v1112_v7 = vld [vmem:[%s1936_s20 + $0x68] sm:$0xff]  ;;  %v1111_v8 = vld [vmem:[%s1936_s20 + $0x60] sm:$0xff]  ;;  %v1114_v9 = vld [vmem:[%s1936_s20 + $0x78] sm:$0xff] }
 0x24f   : > { %v1113_v10 = vld [vmem:[%s1936_s20 + $0x70] sm:$0xff]  ;;  %v1085_v11 = vld [vmem:[#allocation2 + $0x58] sm:$0xff]  ;;  %v2059_v13 = vld [vmem:[%s2172_s5] ss:$0 sm:$0xff]  ;;  %s1305_s20 = sld [smem:[#allocation3]] }
 0x250   : > { %1132 = vperm.xlu1 %1727, %v1102_v61   ;;  %1122 = vperm.xlu0 %1726, %v1100_v62   ;;  %v1083_v12 = vld [vmem:[#allocation2 + $0x30] sm:$0xff]  ;;  %v1086_v18 = vld [vmem:[#allocation2 + $0x18] sm:$0xff]  ;;  %v1084_v19 = vld [vmem:[#allocation2] sm:$0xff] }
 0x251   : > { %v2064_v20 = vld [vmem:[%s2173_s6] ss:$0 sm:$0xff]  ;;  %v1088_v28 = vld [vmem:[#allocation2 + $0x68] sm:$0xff]  ;;  %v1087_v29 = vld [vmem:[#allocation2 + $0x50] sm:$0xff] }
 0x252   : > { %v1090_v38 = vld [vmem:[#allocation2 + $0x48] sm:$0xff]  ;;  %v1092_v48 = vld [vmem:[#allocation2 + $0x20] sm:$0xff]  ;;  %v1094_v58 = vld [vmem:[#allocation2 + $0x38] sm:$0xff] }
 0x253   : > { %v1089_v39 = vld [vmem:[#allocation2 + $0x8] sm:$0xff]  ;;  %v1091_v49 = vld [vmem:[#allocation2 + $0x40] sm:$0xff]  ;;  %v1093_v59 = vld [vmem:[#allocation2 + $0x10] sm:$0xff] }
 0x254   : > { %1142 = vperm.xlu1 %1727, %v1104_v63   ;;  %1137 = vperm.xlu0 %1726, %v1103_v0  }
 0x258   : > { %1152 = vperm.xlu1 %1727, %v1106_v1   ;;  %1147 = vperm.xlu0 %1726, %v1105_v2  }
 0x25c   : > { %1162 = vperm.xlu1 %1727, %v1108_v3   ;;  %1157 = vperm.xlu0 %1726, %v1107_v4   ;;  %v1096_v4 = vld [vmem:[#allocation2 + $0x70] sm:$0xff] }
 0x260   : > { %1172 = vperm.xlu1 %1727, %v1110_v5   ;;  %1167 = vperm.xlu0 %1726, %v1109_v6   ;;  %v1095_v5 = vld [vmem:[#allocation2 + $0x60] sm:$0xff] }
 0x264   : > { %1182 = vperm.xlu1 %1727, %v1112_v7   ;;  %1177 = vperm.xlu0 %1726, %v1111_v8  }
 0x268   : > { %1192 = vperm.xlu1 %1727, %v1114_v9   ;;  %1187 = vperm.xlu0 %1726, %v1113_v10  }
 0x2c7   : > { %v1128_v14 = vpop.permute.xlu1 %1127  ;;  %v1118_v15 = vpop.permute.xlu0 %1117 }
 0x2c8   : > { %v1197_v16 = vmul.f32 %v1128_v14, %v1085_v11  ;;  %v1195_v17 = vmul.f32 %v1118_v15, %v1083_v12  ;;  %v1098_v15 = vld [vmem:[#allocation2 + $0x28] sm:$0xff] }
 0x2ca   : > { %v1220_v21 = vadd.f32 %v2059_v13, %v1197_v16  ;;  %v1218_v22 = vadd.f32 %v2059_v13, %v1195_v17  ;;  %v1097_v16 = vld [vmem:[#allocation2 + $0x78] sm:$0xff] }
 0x2cb   : > { %v1133_v23 = vpop.permute.xlu1 %1132  ;;  %v1123_v24 = vpop.permute.xlu0 %1122 }
 0x2cc   : > { %1236 = vst [vmem:[%s1941_s21 + $0x10] sm:$0xff] %v1220_v21  ;;  %1234 = vst [vmem:[%s1941_s21] sm:$0xff] %v1218_v22  ;;  %v1198_v25 = vmul.f32 %v1133_v23, %v1086_v18  ;;  %v1196_v26 = vmul.f32 %v1123_v24, %v1084_v19  ;;  %v1257_v27 = vmul.f32 %v2064_v20, %v1218_v22 }
 0x2cd   : > { %v1259_v32 = vmul.f32 %v2064_v20, %v1220_v21 }
 0x2ce   : > { %v1221_v30 = vadd.f32 %v2059_v13, %v1198_v25  ;;  %v1219_v31 = vadd.f32 %v2059_v13, %v1196_v26  ;;  %1273 = vadd.xlane.f32.xlu0 %v1257_v27 }
 0x2cf   : > { %v1143_v33 = vpop.permute.xlu1 %1142  ;;  %v1138_v34 = vpop.permute.xlu0 %1137 }
 0x2d0   : > { %1237 = vst [vmem:[%s1941_s21 + $0x18] sm:$0xff] %v1221_v30  ;;  %1235 = vst [vmem:[%s1941_s21 + $0x8] sm:$0xff] %v1219_v31  ;;  %v1200_v35 = vmul.f32 %v1143_v33, %v1088_v28  ;;  %v1199_v36 = vmul.f32 %v1138_v34, %v1087_v29  ;;  %v1258_v37 = vmul.f32 %v2064_v20, %v1219_v31  ;;  %v1306_v31 = vstv %s1305_s20 }
 0x2d1   : > { %v1260_v47 = vmul.f32 %v2064_v20, %v1221_v30 }
 0x2d2   : > { %v1223_v40 = vadd.f32 %v2059_v13, %v1200_v35  ;;  %v1222_v41 = vadd.f32 %v2059_v13, %v1199_v36  ;;  %1275 = vadd.xlane.f32.xlu1 %v1258_v37  ;;  %1277 = vadd.xlane.f32.xlu0 %v1259_v32 }
 0x2d3   : > { %v1153_v42 = vpop.permute.xlu1 %1152  ;;  %v1148_v43 = vpop.permute.xlu0 %1147 }
 0x2d4   : > { %1239 = vst [vmem:[%s1941_s21 + $0x28] sm:$0xff] %v1223_v40  ;;  %1238 = vst [vmem:[%s1941_s21 + $0x20] sm:$0xff] %v1222_v41  ;;  %v1202_v44 = vmul.f32 %v1153_v42, %v1090_v38  ;;  %v1201_v45 = vmul.f32 %v1148_v43, %v1089_v39  ;;  %v1261_v46 = vmul.f32 %v2064_v20, %v1222_v41 }
 0x2d5   : > { %v1262_v57 = vmul.f32 %v2064_v20, %v1223_v40 }
 0x2d6   : > { %v1225_v50 = vadd.f32 %v2059_v13, %v1202_v44  ;;  %v1224_v51 = vadd.f32 %v2059_v13, %v1201_v45  ;;  %1281 = vadd.xlane.f32.xlu1 %v1261_v46  ;;  %1279 = vadd.xlane.f32.xlu0 %v1260_v47 }
 0x2d7   : > { %v1163_v52 = vpop.permute.xlu1 %1162  ;;  %v1158_v53 = vpop.permute.xlu0 %1157 }
 0x2d8   : > { %1241 = vst [vmem:[%s1941_s21 + $0x38] sm:$0xff] %v1225_v50  ;;  %1240 = vst [vmem:[%s1941_s21 + $0x30] sm:$0xff] %v1224_v51  ;;  %v1204_v54 = vmul.f32 %v1163_v52, %v1092_v48  ;;  %v1203_v55 = vmul.f32 %v1158_v53, %v1091_v49  ;;  %v1263_v56 = vmul.f32 %v2064_v20, %v1224_v51 }
 0x2d9   : > { %v1264_v3 = vmul.f32 %v2064_v20, %v1225_v50 }
 0x2da   : > { %v1227_v60 = vadd.f32 %v2059_v13, %v1204_v54  ;;  %v1226_v61 = vadd.f32 %v2059_v13, %v1203_v55  ;;  %1285 = vadd.xlane.f32.xlu1 %v1263_v56  ;;  %1283 = vadd.xlane.f32.xlu0 %v1262_v57 }
 0x2db   : > { %v1173_v62 = vpop.permute.xlu1 %1172  ;;  %v1168_v63 = vpop.permute.xlu0 %1167 }
 0x2dc   : > { %1243 = vst [vmem:[%s1941_s21 + $0x48] sm:$0xff] %v1227_v60  ;;  %1242 = vst [vmem:[%s1941_s21 + $0x40] sm:$0xff] %v1226_v61  ;;  %v1206_v0 = vmul.f32 %v1173_v62, %v1094_v58  ;;  %v1205_v1 = vmul.f32 %v1168_v63, %v1093_v59  ;;  %v1265_v2 = vmul.f32 %v2064_v20, %v1226_v61 }
 0x2dd   : > { %v1266_v14 = vmul.f32 %v2064_v20, %v1227_v60 }
 0x2de   : > { %v1229_v6 = vadd.f32 %v2059_v13, %v1206_v0  ;;  %v1228_v7 = vadd.f32 %v2059_v13, %v1205_v1  ;;  %1289 = vadd.xlane.f32.xlu1 %v1265_v2  ;;  %1287 = vadd.xlane.f32.xlu0 %v1264_v3 }
 0x2df   : > { %v1183_v8 = vpop.permute.xlu1 %1182  ;;  %v1178_v9 = vpop.permute.xlu0 %1177 }
 0x2e0   : > { %1245 = vst [vmem:[%s1941_s21 + $0x58] sm:$0xff] %v1229_v6  ;;  %1244 = vst [vmem:[%s1941_s21 + $0x50] sm:$0xff] %v1228_v7  ;;  %v1208_v10 = vmul.f32 %v1183_v8, %v1096_v4  ;;  %v1207_v11 = vmul.f32 %v1178_v9, %v1095_v5  ;;  %v1267_v12 = vmul.f32 %v2064_v20, %v1228_v7 }
 0x2e1   : > { %v1268_v25 = vmul.f32 %v2064_v20, %v1229_v6 }
 0x2e2   : > { %v1231_v17 = vadd.f32 %v2059_v13, %v1208_v10  ;;  %v1230_v18 = vadd.f32 %v2059_v13, %v1207_v11  ;;  %1293 = vadd.xlane.f32.xlu1 %v1267_v12  ;;  %1291 = vadd.xlane.f32.xlu0 %v1266_v14 }
 0x2e3   : > { %v1193_v19 = vpop.permute.xlu1 %1192  ;;  %v1188_v21 = vpop.permute.xlu0 %1187 }
 0x2e4   : > { %1247 = vst [vmem:[%s1941_s21 + $0x68] sm:$0xff] %v1231_v17  ;;  %1246 = vst [vmem:[%s1941_s21 + $0x60] sm:$0xff] %v1230_v18  ;;  %v1210_v22 = vmul.f32 %v1193_v19, %v1098_v15  ;;  %v1209_v23 = vmul.f32 %v1188_v21, %v1097_v16  ;;  %v1269_v24 = vmul.f32 %v2064_v20, %v1230_v18 }
 0x2e5   : > { %v1270_v29 = vmul.f32 %v2064_v20, %v1231_v17 }
 0x2e6   : > { %v1233_v26 = vadd.f32 %v2059_v13, %v1210_v22  ;;  %v1232_v27 = vadd.f32 %v2059_v13, %v1209_v23  ;;  %1297 = vadd.xlane.f32.xlu1 %v1269_v24  ;;  %1295 = vadd.xlane.f32.xlu0 %v1268_v25 }
 0x2e8   : > { %1249 = vst [vmem:[%s1941_s21 + $0x78] sm:$0xff] %v1233_v26  ;;  %1248 = vst [vmem:[%s1941_s21 + $0x70] sm:$0xff] %v1232_v27  ;;  %v1271_v28 = vmul.f32 %v2064_v20, %v1232_v27  ;;  %v1272_v30 = vmul.f32 %v2064_v20, %v1233_v26 }
 0x2ea   : > { %1301 = vadd.xlane.f32.xlu1 %v1271_v28  ;;  %1299 = vadd.xlane.f32.xlu0 %v1270_v29 }
 0x2ee   : > { %1303 = vadd.xlane.f32.xlu0 %v1272_v30 }
 0x357   : > { %v1274_v13 = vpop.xlane.xlu0 %1273 }
 0x358   : > { %v1307_v32 = vadd.f32 %v1306_v31, %v1274_v13 }
 0x35a   : > { %1324 = vst.msk [vmem:[%s1946_s1] sm:$0xff] %vm1323_vm0, %v1307_v32 }
 0x35b   : > { %v1276_v33 = vpop.xlane.xlu1 %1275  ;;  %v1278_v34 = vpop.xlane.xlu0 %1277 }
 0x35c   : > { %v1308_v35 = vadd.f32 %v1306_v31, %v1276_v33  ;;  %v1309_v36 = vadd.f32 %v1306_v31, %v1278_v34 }
 0x35e   : > { %1325 = vst.msk [vmem:[%s1946_s1 + $0x8] sm:$0xff] %vm1323_vm0, %v1308_v35  ;;  %1326 = vst.msk [vmem:[%s1946_s1 + $0x10] sm:$0xff] %vm1323_vm0, %v1309_v36 }
 0x35f   : > { %v1282_v20 = vpop.xlane.xlu1 %1281  ;;  %v1280_v37 = vpop.xlane.xlu0 %1279 }
 0x360   : > { %v1311_v38 = vadd.f32 %v1306_v31, %v1282_v20  ;;  %v1310_v39 = vadd.f32 %v1306_v31, %v1280_v37 }
 0x362   : > { %1328 = vst.msk [vmem:[%s1946_s1 + $0x20] sm:$0xff] %vm1323_vm0, %v1311_v38  ;;  %1327 = vst.msk [vmem:[%s1946_s1 + $0x18] sm:$0xff] %vm1323_vm0, %v1310_v39 }
 0x363   : > { %v1286_v40 = vpop.xlane.xlu1 %1285  ;;  %v1284_v41 = vpop.xlane.xlu0 %1283 }
 0x364   : > { %v1313_v42 = vadd.f32 %v1306_v31, %v1286_v40  ;;  %v1312_v43 = vadd.f32 %v1306_v31, %v1284_v41 }
 0x366   : > { %1330 = vst.msk [vmem:[%s1946_s1 + $0x30] sm:$0xff] %vm1323_vm0, %v1313_v42  ;;  %1329 = vst.msk [vmem:[%s1946_s1 + $0x28] sm:$0xff] %vm1323_vm0, %v1312_v43 }
 0x367   : > { %v1290_v44 = vpop.xlane.xlu1 %1289  ;;  %v1288_v45 = vpop.xlane.xlu0 %1287 }
 0x368   : > { %v1315_v46 = vadd.f32 %v1306_v31, %v1290_v44  ;;  %v1314_v47 = vadd.f32 %v1306_v31, %v1288_v45 }
 0x36a   : > { %1332 = vst.msk [vmem:[%s1946_s1 + $0x40] sm:$0xff] %vm1323_vm0, %v1315_v46  ;;  %1331 = vst.msk [vmem:[%s1946_s1 + $0x38] sm:$0xff] %vm1323_vm0, %v1314_v47 }
 0x36b   : > { %v1294_v48 = vpop.xlane.xlu1 %1293  ;;  %v1292_v49 = vpop.xlane.xlu0 %1291 }
 0x36c   : > { %v1317_v50 = vadd.f32 %v1306_v31, %v1294_v48  ;;  %v1316_v51 = vadd.f32 %v1306_v31, %v1292_v49 }
 0x36e   : > { %1334 = vst.msk [vmem:[%s1946_s1 + $0x50] sm:$0xff] %vm1323_vm0, %v1317_v50  ;;  %1333 = vst.msk [vmem:[%s1946_s1 + $0x48] sm:$0xff] %vm1323_vm0, %v1316_v51 }
 0x36f   : > { %v1298_v52 = vpop.xlane.xlu1 %1297  ;;  %v1296_v53 = vpop.xlane.xlu0 %1295 }
 0x370   : > { %v1319_v54 = vadd.f32 %v1306_v31, %v1298_v52  ;;  %v1318_v55 = vadd.f32 %v1306_v31, %v1296_v53 }
 0x372   : > { %1336 = vst.msk [vmem:[%s1946_s1 + $0x60] sm:$0xff] %vm1323_vm0, %v1319_v54  ;;  %1335 = vst.msk [vmem:[%s1946_s1 + $0x58] sm:$0xff] %vm1323_vm0, %v1318_v55 }
 0x373   : > { %v1302_v56 = vpop.xlane.xlu1 %1301  ;;  %v1300_v57 = vpop.xlane.xlu0 %1299 }
 0x374   : > { %v1321_v58 = vadd.f32 %v1306_v31, %v1302_v56  ;;  %v1320_v59 = vadd.f32 %v1306_v31, %v1300_v57 }
 0x376   : > { %1338 = vst.msk [vmem:[%s1946_s1 + $0x70] sm:$0xff] %vm1323_vm0, %v1321_v58  ;;  %1337 = vst.msk [vmem:[%s1946_s1 + $0x68] sm:$0xff] %vm1323_vm0, %v1320_v59 }
 0x377   : > { %v1304_v60 = vpop.xlane.xlu0 %1303 }
 0x378   : > { %v1322_v61 = vadd.f32 %v1306_v31, %v1304_v60 }
 0x37a   : > { %1339 = vst.msk [vmem:[%s1946_s1 + $0x78] sm:$0xff] %vm1323_vm0, %v1322_v61 }
 0x37b PF: > { %s21_s17 = sadd.s32 1, %s1782_s17   ;;  %s2183_s21 = sld [smem:[#allocation5_spill]] }
 0x37c   : > { %p18_p0 = scmp.ge.s32.totalorder %s21_s17, 6   ;;  %s2184_s11 = smov %s1762_s12 }
 0x37d   : > { %s2185_s12 = smov %s1891_s23  ;;  %s2186_s13 = smov %s1774_s15 }
 0x37e   : > { %s2187_s14 = smov %s1778_s16  ;;  %s2188_s15 = smov %s2191_s7 }
 0x37f   :  { %20 = sbr.rel (!%p18_p0) target bundleno = 8 (0x8), region = 157 }
 0x381   : > { %s2189_s16 = smov %s2183_s21 }

</bundles_post_ra>
